<compile_context>
chip_gen: v7x
topology: tpu7x:2x2x1
jax: 0.10.0
libtpu: 0.0.40
codegen_flags: <defaults>
</compile_context>

<pallas_src>
import jax
import jax.numpy as jnp
from jax.experimental import pallas as pl
from jax.experimental.pallas import tpu as pltpu


def _output_block_kernel(x_ref, w1_ref, b1_ref, w2_ref, b2_ref, o_ref):
    # x_ref: (Bb, C, Tt) slab; o_ref: (Bb, OUT, Tt).  Bb is a small static block.
    w1 = w1_ref[...]            # (C, C)   BN-folded conv1 weight
    w2 = w2_ref[...]            # (OUT, C) conv2 weight
    b1 = b1_ref[...]            # (C, 1)   f32 folded bias
    b2 = b2_ref[...]            # (OUT, 1) f32 bias
    for bi in range(x_ref.shape[0]):          # tiny static unroll over batch rows
        h = jnp.dot(w1, x_ref[bi], preferred_element_type=jnp.float32)
        h = jnp.maximum(h + b1, 0.0)          # bias + ReLU in f32 (VPU)
        h = h.astype(w2.dtype)                # match MXU operand dtype
        o = jnp.dot(w2, h, preferred_element_type=jnp.float32)
        o_ref[bi] = (o + b2).astype(o_ref.dtype)


def output_block(x_ncw, params, *, t_tile=8192, out_dtype=jnp.float32,
                 vmem_budget_bytes=24 << 20):
    """x_ncw: (B, C, T).  Returns (B, out_channels*num_classes, T) in out_dtype."""
    w1, b1, gamma, beta, run_mean, run_var, w2, b2 = params
    eps = 1e-5
    B, C, T = x_ncw.shape
    OUT = w2.shape[0]

    # --- parameter glue (once, not in the hot path) -------------------------
    scale = gamma / jnp.sqrt(run_var + eps)                    # (C,)
    w1_folded = w1[:, :, 0] * scale[:, None]                   # diag(scale) @ W1
    bias1 = scale * (b1 - run_mean) + beta                     # (C,)
    w2m = w2[:, :, 0]                                          # (OUT, C)

    # Weights follow the activation dtype (no HBM re-materialization of x);
    # biases stay f32 for the epilogue.
    compute_dtype = x_ncw.dtype
    w1_in = w1_folded.astype(compute_dtype)
    w2_in = w2m.astype(compute_dtype)
    b1_in = bias1.reshape(C, 1).astype(jnp.float32)
    b2_in = b2.reshape(OUT, 1).astype(jnp.float32)

    in_itemsize = jnp.dtype(compute_dtype).itemsize
    out_itemsize = jnp.dtype(out_dtype).itemsize

    # --- T tile (lane axis) --------------------------------------------------
    # Big tiles amortize per-step overhead; cap by a v7x-safe VMEM budget
    # (double-buffered x block + out block, weights are negligible).
    per_lane = 2 * (C * in_itemsize + OUT * out_itemsize)
    max_lanes = max(128, (vmem_budget_bytes // per_lane) // 128 * 128)
    t_cap = min(t_tile, max_lanes)
    if T <= t_cap:
        t_blk = T                                # full extent: always legal
    else:
        t_blk = max(128, (t_cap // 128) * 128)   # lane-aligned tile
    num_t = pl.cdiv(T, t_blk)                    # ragged final block is masked

    # --- batch tile ----------------------------------------------------------
    # For small-T workloads pack several batch rows per grid step; keep >=2
    # grid steps when possible so v7x's two TensorCores both get work.
    b_tile = 1
    if num_t == 1 and B > 1:
        target = max(1, 1024 // max(T, 1))
        target = min(target, max(1, B // 2), B)
        for cand in range(target, 0, -1):
            if B % cand == 0:
                b_tile = cand
                break
    grid = (pl.cdiv(B, b_tile), num_t)

    out = pl.pallas_call(
        _output_block_kernel,
        out_shape=jax.ShapeDtypeStruct((B, OUT, T), out_dtype),
        grid=grid,
        in_specs=[
            pl.BlockSpec((b_tile, C, t_blk), lambda b, t: (b, 0, t)),   # x slab
            pl.BlockSpec((C, C), lambda b, t: (0, 0)),                  # W1 (BN-folded)
            pl.BlockSpec((C, 1), lambda b, t: (0, 0)),                  # b1'
            pl.BlockSpec((OUT, C), lambda b, t: (0, 0)),                # W2
            pl.BlockSpec((OUT, 1), lambda b, t: (0, 0)),                # b2
        ],
        out_specs=pl.BlockSpec((b_tile, OUT, t_blk), lambda b, t: (b, 0, t)),
        compiler_params=pltpu.CompilerParams(
            dimension_semantics=("parallel", "parallel")),
    )(x_ncw, w1_in, b1_in, w2_in, b2_in)
    return out


def _reference(x_ncw, params):
    """Pure-JAX reference of the PyTorch forward (eval-mode BN), NCW layout."""
    w1, b1, gamma, beta, run_mean, run_var, w2, b2 = params
    eps = 1e-5
    h = jnp.einsum("oc,bct->bot", w1[:, :, 0], x_ncw) + b1[None, :, None]
    h = (h - run_mean[None, :, None]) / jnp.sqrt(run_var + eps)[None, :, None]
    h = h * gamma[None, :, None] + beta[None, :, None]
    h = jnp.maximum(h, 0.0)
    o = jnp.einsum("oc,bct->bot", w2[:, :, 0], h) + b2[None, :, None]
    return o


if __name__ == "__main__":
    # Small shapes consistent with the module.
    B, C, T = 2, 32, 64
    out_channels, num_classes = 4, 4
    OUT = out_channels * num_classes

    key = jax.random.PRNGKey(0)
    keys = jax.random.split(key, 8)

    x = jax.random.normal(keys[0], (B, C, T), dtype=jnp.float32)

    # Deterministic synthetic parameters (shapes from nn.Conv1d / nn.BatchNorm1d).
    w1 = jax.random.normal(keys[1], (C, C, 1), dtype=jnp.float32) * 0.1
    b1 = jax.random.normal(keys[2], (C,), dtype=jnp.float32) * 0.1
    gamma = 1.0 + 0.1 * jax.random.normal(keys[3], (C,), dtype=jnp.float32)
    beta = 0.1 * jax.random.normal(keys[4], (C,), dtype=jnp.float32)
    run_mean = 0.05 * jax.random.normal(keys[5], (C,), dtype=jnp.float32)
    run_var = jnp.abs(1.0 + 0.1 * jax.random.normal(keys[6], (C,),
                                                    dtype=jnp.float32))
    w2 = jax.random.normal(keys[7], (OUT, C, 1), dtype=jnp.float32) * 0.1
    b2 = jnp.linspace(-0.1, 0.1, OUT, dtype=jnp.float32)

    params = (w1, b1, gamma, beta, run_mean, run_var, w2, b2)
    ref = _reference(x, params)

    # 1) f32 path, small T (single full-extent T block).
    out = jax.block_until_ready(output_block(x, params))
    assert out.shape == (B, OUT, T)
    assert jnp.allclose(out, ref, atol=1e-4, rtol=1e-4)

    # 2) Ragged-T path: T not a multiple of the tile, no pad/slice in wrapper.
    T2 = 200
    x2 = jax.random.normal(jax.random.PRNGKey(1), (B, C, T2), dtype=jnp.float32)
    ref2 = _reference(x2, params)
    out2 = jax.block_until_ready(output_block(x2, params, t_tile=128))
    assert out2.shape == (B, OUT, T2)
    assert jnp.allclose(out2, ref2, atol=1e-4, rtol=1e-4)

    # 3) bf16 activations supplied by the producer (weights follow x's dtype),
    #    bf16 output to halve writeback traffic; loose tolerance.
    out_bf16 = jax.block_until_ready(
        output_block(x.astype(jnp.bfloat16), params, out_dtype=jnp.bfloat16))
    assert out_bf16.shape == (B, OUT, T)
    assert jnp.allclose(out_bf16.astype(jnp.float32), ref, atol=1e-1, rtol=1e-1)

    print("KERNEL_OK")
</pallas_src>

<mosaic_0001>
module attributes {stable_mosaic.version = 11 : i64} {
  func.func @_output_block_kernel(%arg0: i32, %arg1: i32, %arg2: memref<1x32x64xf32, #tpu.memory_space<vmem>>, %arg3: memref<32x32xf32, #tpu.memory_space<vmem>>, %arg4: memref<32x1xf32, #tpu.memory_space<vmem>>, %arg5: memref<16x32xf32, #tpu.memory_space<vmem>>, %arg6: memref<16x1xf32, #tpu.memory_space<vmem>>, %arg7: memref<1x16x64xf32, #tpu.memory_space<vmem>>) attributes {dimension_semantics = [#tpu.dimension_semantics<parallel>, #tpu.dimension_semantics<parallel>], iteration_bounds = array<i64: 2, 1>, scalar_prefetch = 0 : i64, scratch_operands = 0 : i64, tpu.core_type = #tpu.core_type<tc>, window_params = [{transform_indices = @transform_0, window_bounds = array<i64: 1, 32, 64>}, {pipeline_mode = #tpu.pipeline_mode<synchronous>, transform_indices = @transform_1, window_bounds = array<i64: 32, 32>}, {pipeline_mode = #tpu.pipeline_mode<synchronous>, transform_indices = @transform_2, window_bounds = array<i64: 32, 1>}, {pipeline_mode = #tpu.pipeline_mode<synchronous>, transform_indices = @transform_3, window_bounds = array<i64: 16, 32>}, {pipeline_mode = #tpu.pipeline_mode<synchronous>, transform_indices = @transform_4, window_bounds = array<i64: 16, 1>}, {transform_indices = @transform_5, window_bounds = array<i64: 1, 16, 64>}]} {
    %c0 = arith.constant 0 : index
    %c0_0 = arith.constant 0 : index
    %0 = vector.load %arg3[%c0, %c0_0] : memref<32x32xf32, #tpu.memory_space<vmem>>, vector<32x32xf32>
    %c0_1 = arith.constant 0 : index
    %c0_2 = arith.constant 0 : index
    %1 = vector.load %arg5[%c0_1, %c0_2] : memref<16x32xf32, #tpu.memory_space<vmem>>, vector<16x32xf32>
    %c0_3 = arith.constant 0 : index
    %c0_4 = arith.constant 0 : index
    %2 = vector.load %arg4[%c0_3, %c0_4] : memref<32x1xf32, #tpu.memory_space<vmem>>, vector<32x1xf32>
    %c0_5 = arith.constant 0 : index
    %c0_6 = arith.constant 0 : index
    %3 = vector.load %arg6[%c0_5, %c0_6] : memref<16x1xf32, #tpu.memory_space<vmem>>, vector<16x1xf32>
    %c0_7 = arith.constant 0 : index
    %c0_8 = arith.constant 0 : index
    %c0_9 = arith.constant 0 : index
    %4 = vector.load %arg2[%c0_7, %c0_8, %c0_9] : memref<1x32x64xf32, #tpu.memory_space<vmem>>, vector<1x32x64xf32>
    %5 = vector.shape_cast %4 : vector<1x32x64xf32> to vector<32x64xf32>
    %cst = arith.constant dense<0.000000e+00> : vector<32x64xf32>
    %6 = tpu.matmul %0, %5, %cst {dimension_numbers = #tpu.dot_dimension_numbers<[1], [0], [0], [1], [0, 0, 1, 1], [], []>} : vector<32x32xf32>, vector<32x64xf32>, vector<32x64xf32> -> vector<32x64xf32>
    %7 = vector.broadcast %2 : vector<32x1xf32> to vector<32x64xf32>
    %8 = arith.addf %6, %7 : vector<32x64xf32>
    %cst_10 = arith.constant 0.000000e+00 : f32
    %9 = vector.broadcast %cst_10 : f32 to vector<32x64xf32>
    %10 = arith.maximumf %8, %9 : vector<32x64xf32>
    %cst_11 = arith.constant dense<0.000000e+00> : vector<16x64xf32>
    %11 = tpu.matmul %1, %10, %cst_11 {dimension_numbers = #tpu.dot_dimension_numbers<[1], [0], [0], [1], [0, 0, 1, 1], [], []>} : vector<16x32xf32>, vector<32x64xf32>, vector<16x64xf32> -> vector<16x64xf32>
    %12 = vector.broadcast %3 : vector<16x1xf32> to vector<16x64xf32>
    %13 = arith.addf %11, %12 : vector<16x64xf32>
    %c0_12 = arith.constant 0 : index
    %c0_13 = arith.constant 0 : index
    %c0_14 = arith.constant 0 : index
    %14 = vector.load %arg7[%c0_12, %c0_13, %c0_14] : memref<1x16x64xf32, #tpu.memory_space<vmem>>, vector<1x16x64xf32>
    %15 = vector.shape_cast %14 : vector<1x16x64xf32> to vector<16x64xf32>
    %16 = vector.shape_cast %13 : vector<16x64xf32> to vector<1x16x64xf32>
    tpu.vector_store %arg7[%c0_12, %c0_13, %c0_14], %16 {strides = array<i32>} : memref<1x16x64xf32, #tpu.memory_space<vmem>>, vector<1x16x64xf32>,
    return
  }
  func.func @transform_0(%arg0: i32, %arg1: i32) -> (i32, i32, i32) {
    %c0_i32 = arith.constant 0 : i32
    %c0_i32_0 = arith.constant 0 : i32
    return %arg0, %c0_i32, %arg1 : i32, i32, i32
  }
  func.func @transform_1(%arg0: i32, %arg1: i32) -> (i32, i32) {
    %c0_i32 = arith.constant 0 : i32
    %c0_i32_0 = arith.constant 0 : i32
    %c0_i32_1 = arith.constant 0 : i32
    return %c0_i32, %c0_i32_0 : i32, i32
  }
  func.func @transform_2(%arg0: i32, %arg1: i32) -> (i32, i32) {
    %c0_i32 = arith.constant 0 : i32
    %c0_i32_0 = arith.constant 0 : i32
    %c0_i32_1 = arith.constant 0 : i32
    return %c0_i32, %c0_i32_0 : i32, i32
  }
  func.func @transform_3(%arg0: i32, %arg1: i32) -> (i32, i32) {
    %c0_i32 = arith.constant 0 : i32
    %c0_i32_0 = arith.constant 0 : i32
    %c0_i32_1 = arith.constant 0 : i32
    return %c0_i32, %c0_i32_0 : i32, i32
  }
  func.func @transform_4(%arg0: i32, %arg1: i32) -> (i32, i32) {
    %c0_i32 = arith.constant 0 : i32
    %c0_i32_0 = arith.constant 0 : i32
    %c0_i32_1 = arith.constant 0 : i32
    return %c0_i32, %c0_i32_0 : i32, i32
  }
  func.func @transform_5(%arg0: i32, %arg1: i32) -> (i32, i32, i32) {
    %c0_i32 = arith.constant 0 : i32
    %c0_i32_0 = arith.constant 0 : i32
    return %arg0, %c0_i32, %arg1 : i32, i32, i32
  }
}

</mosaic_0001>

<bundles_post_ra>
// kernel: tpu_custom_call.1
= control target key start
LH: loop header
LB: loop body
LE: loop exit
PB: predicated region body
PF: predicated region fallthrough
CT: control target
= control target key end

     0   :  { %10 = vsyncpa [#allocation3], 0  ;;  %s1108_s0 = inlined_call_operand.hbm [shape: f32[2,32,64], index: 0, kind: input, shape index: {}]   ;;  %s1109_s1 = inlined_call_operand.vmem [shape: f32[32,32], index: 1, kind: input, shape index: {}]   ;;  %s1110_s2 = inlined_call_operand.vmem [shape: f32[32,1], index: 2, kind: input, shape index: {}]   ;;  %s1111_s3 = inlined_call_operand.vmem [shape: f32[16,32], index: 3, kind: input, shape index: {}]   ;;  %s1112_s4 = inlined_call_operand.vmem [shape: f32[16,1], index: 4, kind: input, shape index: {}]   ;;  %s1113_s5 = inlined_call_operand.hbm [shape: f32[2,16,64], index: 5, kind: output, shape index: {}]  }
   0x1   :  { %12 = vsyncpa [#allocation3 + $0x1], 0 }
   0x2   :  { %13 = vsyncpa [#allocation4], 0 }
   0x3   :  { %15 = vsyncpa [#allocation4 + $0x1], 0  ;;  %s890_s18 = smov 0   ;;  %s892_s19 = smov 0  }
   0x4   :  { %s894_s20 = smov 0   ;;  %s896_s21 = smov 0  }
   0x5   :  { %s898_s22 = smov 0   ;;  %s900_s23 = smov 0  }
   0x6 LB: > { %s592_s24 = sadd.s32 4294967295, %s851_s23   ;;  %s593_s25 = sadd.s32 4294967294, %s851_s23   ;;  %s851_s23 = sphi %s900_s23, %s21_s23   ;;  %s847_s22 = sphi %s898_s22, %s1128_s22   ;;  %s843_s21 = sphi %s896_s21, %s1127_s21   ;;  %s839_s20 = sphi %s894_s20, %s1126_s20   ;;  %s835_s19 = sphi %s892_s19, %s1125_s19   ;;  %s831_s18 = sphi %s890_s18, %s1124_s18  }
   0x7   : > { %s33_s26 = sadd.s32 1, %s847_s22  ;;  %s42_s27 = sadd.s32 1, %s839_s20 }
   0x8   : > { %p35_p0 = scmp.ge.s32.totalorder %s33_s26, 2  ;;  %p49_p1 = scmp.ne.s32.totalorder %s839_s20, %s835_s19 }
   0x9   : > { %p50_p2 = scmp.eq.s32.totalorder %s851_s23, 0  ;;  %p55_p3 = scmp.ne.s32.totalorder %s835_s19, %s831_s18 }
   0xa   : > { %s1130_s26 = smov (%p35_p0, %s33_s26), 0  ;;  %p56_p5 = scmp.eq.s32.totalorder %s592_s24, 0 }
   0xb   : > { %p931_p4 = por %p50_p2, %p49_p1  ;;  %s37_s29 = ssub.s32 %s847_s22, %s1130_s26 }
   0xc   : > { %p165_p6 = scmp.eq.s32.totalorder %s592_s24, 1  ;;  %p40_p7 = scmp.eq.s32.totalorder %s37_s29, 0 }
   0xd   : > { %p937_p8 = por %p56_p5, %p55_p3  ;;  %p171_p10 = scmp.eq.s32.totalorder %s593_s25, 1 }
   0xe   : > { %p941_p9 = por %p165_p6, %p49_p1  ;;  %p682_p13 = scmp.lt.s32.totalorder %s851_s23, 2 }
   0xf   : > { %s946_s7 = scalar_select %p40_p7, %s839_s20, %s42_s27  }
  0x10   : > { %s1117_s6 = scalar_select %p941_p9, 1, 0 }
  0x11   : > { %p948_p11 = por %p171_p10, %p55_p3  ;;  %s203_s9 = sand.u32 1, %s839_s20  }
  0x12   : > { %s596_s10 = sshll.u32 %s203_s9, 5  ;;  %s613_s11 = sshll.u32 %s847_s22, 9 }
  0x13   : > { %s1118_s8 = scalar_select %p948_p11, 1, 0 }
  0x14   : > { %s959_s14 = scalar_lea.hbm %s1108_s0, %s613_s11  ;;  %s207_s15 = scalar_lea.vmem [#allocation2], %s596_s10 }
  0x15   : > { %s215_s16 = sshll.u32 %s207_s15, 4  ;;  %p965_p0 = pnand %p682_p13, %p931_p4  ;;  %s961_s16 = int_to_ptr.vmem [resolvable:$true] %s215_s16 }
  0x16   : > { %s970_s24 = scalar_lea.sflag [#allocation3], %s203_s9  ;;  %s739_s25 = scalar_lea.hbm %s959_s14, 512 }
  0x17   : > { %p740_p2 = scmp.ne.s32.totalorder %s959_s14, %s739_s25  ;;  %p741_p3 = pneg %p965_p0 }
  0x18   : > { %s744_s28 = scalar_lea.hbm %s1108_s0, 1024  ;;  %p745_p4 = scmp.lt.u32.totalorder %s959_s14, %s1108_s0 }
  0x19   : > { %p742_p5 = pnand %p741_p3, %p740_p2  ;;  %p746_p7 = scmp.lt.u32.totalorder %s744_s28, %s739_s25 }
  0x1a   : > { %p748_p13 = scmp.lt.u32.totalorder %s739_s25, %s959_s14 }
  0x1b   : > { %p743_p6 = pneg %p742_p5  ;;  %p747_p10 = por %p746_p7, %p745_p4 }
  0x1d   : > { %p749_p12 = por %p748_p13, %p747_p10 }
  0x1f   : > { %p750_p1 = pnand %p749_p12, %p743_p6 }
  0x21   : > { %753 = shalt.err (!%p750_p1)
}
  0x22   : > { %s754_s9 = scalar_lea.vmem %s961_s16, 512  ;;  %s853_s12 = smov [#allocation2]  }
  0x23   : > { %p755_p2 = scmp.ne.s32.totalorder %s961_s16, %s754_s9  ;;  %s759_s13 = sshll.u32 %s853_s12, 4  ;;  %s760_s13 = int_to_ptr.vmem [resolvable:$false] %s759_s13 }
  0x24   : > { %s761_s15 = scalar_lea.vmem %s760_s13, 1024  ;;  %p762_p9 = scmp.lt.s32.totalorder %s961_s16, %s760_s13 }
  0x25   : > { %p757_p5 = pnand %p755_p2, %p741_p3  ;;  %p763_p4 = scmp.lt.s32.totalorder %s761_s15, %s754_s9 }
  0x27   : > { %p758_p11 = pneg %p757_p5  ;;  %p764_p7 = por %p763_p4, %p762_p9 }
  0x29   : > { %p765_p10 = pnand %p764_p7, %p758_p11 }
  0x2b   : > { %768 = shalt.err (!%p765_p10)
}
  0x2c   : > { %s854_s25 = smov 128   ;;  %s855_s27 = smov 8  }
  0x2d   : > { %677 = dma.hbm_to_vmem [thread:$0]  (!%p965_p0), %s959_s14, 512, %s961_s16, %s970_s24, %s854_s25, %s854_s25, %s855_s27  }
  0x2e   : > { %p223_p12 = scmp.lt.s32.totalorder %s851_s23, 3  ;;  %p1120_p1 = scmp.ge.s32.totalorder %s851_s23, 1 }
  0x30   : > { %p224_p3 = pnand %p1120_p1, %p223_p12 }
  0x31   : > { %s1002_s29 = sand.u32 (!%p224_p3), 1, %s835_s19  }
  0x32   : > { %227 = sbr.rel (%p224_p3) target bundleno = 526 (0x20e), region = 40  ;;  %s600_s28 = sshll.u32 (!%p224_p3), %s1002_s29, 5 }
  0x33   : > { %s230_s10 = scalar_lea.sflag (!%p224_p3), [#allocation3], %s1002_s29  ;;  %s233_s11 = scalar_lea.vmem (!%p224_p3), [#allocation2], %s600_s28 }
  0x39   : > { %822 = dma.done.wait (%p937_p8), %s230_s10, 512  }
  0x3a   : > { %824 = vsyncadd (%p937_p8), %s230_s10, 4294966784  ;;  %v856_v0 = vmov 0   ;;  %vm296_vm0 = vcmask 261120   ;;  %v272_v1 = vld [vmem:[%s233_s11] sm:$0xff]  ;;  %v273_v2 = vld [vmem:[%s233_s11 + $0x8] sm:$0xff]  ;;  %s601_s27 = sshll.u32 %s1002_s29, 4 }
  0x3b   : > { %737 = vset.pattern.permute.xlu0 %v856_v0  ;;  %738 = vset.pattern.permute.xlu1 %v856_v0  ;;  %v274_v3 = vld [vmem:[%s233_s11 + $0x10] sm:$0xff]  ;;  %v654_v4 = vpack.c.bf16 %v273_v2, %v272_v1  ;;  %v275_v5 = vld [vmem:[%s233_s11 + $0x18] sm:$0xff]  ;;  %v260_v6 = vld [vmem:[%s1109_s1] sm:$0xff]  ;;  %s259_s28 = scalar_lea.vmem [#allocation5], %s601_s27  ;;  %s614_s11 = sshll.u32 %s843_s21, 8  ;;  %vm489_vm1 = vcmask 523264  }
  0x3c   : > { %v658_v7 = vpack.c.bf16 %v275_v5, %v274_v3  ;;  %637 = vmatprep.mubr.msk.f32.mxu0 %vm296_vm0, %v260_v6  ;;  %v266_v8 = vld [vmem:[%s1110_s2] sm:$0xff]  ;;  %v268_v9 = vld [vmem:[%s1110_s2 + $0x10] sm:$0xff]  ;;  %v267_v10 = vld [vmem:[%s1110_s2 + $0x8] sm:$0xff]  ;;  %s507_s10 = sshll.u32 %s259_s28, 4  ;;  %s1059_s17 = scalar_lea.hbm %s1113_s5, %s614_s11  ;;  %s1054_s10 = int_to_ptr.vmem [resolvable:$true] %s507_s10 }
  0x3d   : > { %655 = vmatprep.subr.bf16.mxu0 %v654_v4  ;;  %278 = vperm.xlu0 %737, %v266_v8   ;;  %v269_v11 = vld [vmem:[%s1110_s2 + $0x18] sm:$0xff]  ;;  %v261_v12 = vld [vmem:[%s1109_s1 + $0x8] sm:$0xff]  ;;  %v270_v13 = vld [vmem:[%s1112_s4] sm:$0xff]  ;;  %s493_s21 = scalar_lea.sflag [#allocation4], %s1002_s29  ;;  %s769_s24 = scalar_lea.vmem %s1054_s10, 256 }
  0x3e   : > { %657 = vmatpush3.bf16.msra.mxu0 %v654_v4  ;;  %288 = vperm.xlu1 %738, %v268_v9   ;;  %v262_v14 = vld [vmem:[%s1109_s1 + $0x10] sm:$0xff]  ;;  %v271_v15 = vld [vmem:[%s1112_s4 + $0x8] sm:$0xff]  ;;  %v263_v16 = vld [vmem:[%s1109_s1 + $0x18] sm:$0xff]  ;;  %p770_p8 = scmp.ne.s32.totalorder %s1054_s10, %s769_s24  ;;  %p1121_p9 = scmp.ne.s32.totalorder %s1117_s6, 0 }
  0x3f   : > { %659 = vmatprep.subr.bf16.mxu0 %v658_v7  ;;  %v264_v17 = vld [vmem:[%s1111_s3] sm:$0xff]  ;;  %v265_v36 = vld [vmem:[%s1111_s3 + $0x8] sm:$0xff]  ;;  %s857_s30 = smov [#allocation5]  }
  0x40   : > { %651 = vmatprep.mubr.msk.f32.mxu1 %vm296_vm0, %v264_v17  ;;  %p771_p11 = pnand %p770_p8, %p1121_p9  ;;  %s773_s9 = sshll.u32 %s857_s30, 4  ;;  %s774_s9 = int_to_ptr.vmem [resolvable:$false] %s773_s9 }
  0x41   : > { %283 = vperm.xlu0 %737, %v267_v10   ;;  %s775_s12 = scalar_lea.vmem %s774_s9, 512  ;;  %p776_p6 = scmp.lt.s32.totalorder %s1054_s10, %s774_s9 }
  0x42   : > { %661 = vmatpush3.bf16.msra.mxu0 %v658_v7  ;;  %293 = vperm.xlu1 %738, %v269_v11   ;;  %p772_p0 = pneg %p771_p11  ;;  %p777_p13 = scmp.lt.s32.totalorder %s775_s12, %s769_s24 }
  0x44   : > { %p778_p2 = por %p777_p13, %p776_p6 }
  0x45   : > { %638 = vmatmul.mubr.msk.f32.vlgmr.msra.gmra.mrb[0].mxu0 %vm296_vm0, %v261_v12  ;;  %400 = vperm.xlu0 %737, %v270_v13  }
  0x46   : > { %640 = vmatprep.mubr.msk.f32.mxu0 %vm296_vm0, %v262_v14  ;;  %405 = vperm.xlu1 %738, %v271_v15   ;;  %p779_p5 = pnand %p778_p2, %p772_p0 }
  0x49   : > { %641 = vmatmul.mubr.msk.f32.gmra.mrb[2].mxu0 %vm296_vm0, %v263_v16 }
  0xbc   : > { %v279_v18 = vpop.permute.xlu0 %278 }
  0xbd   : > { %v289_v19 = vpop.permute.xlu1 %288 }
  0xc0   : > { %v284_v20 = vpop.permute.xlu0 %283 }
  0xc1   : > { %v294_v26 = vpop.permute.xlu1 %293 }
  0xc4   : > { %v401_v39 = vpop.permute.xlu0 %400 }
  0xc5   : > { %v406_v37 = vpop.permute.xlu1 %405 }
 0x118   : > { %v639_v21 = vpop.f32.mrb[0].mxu0 }
 0x119   : > { %v381_v22 = vadd.f32 %v639_v21, %v284_v20  ;;  %v375_v23 = vpop.f32.mrb[1].mxu0 }
 0x11a   : > { %v376_v24 = vadd.f32 %v375_v23, %v279_v18 }
 0x11b   : > { %v395_v25 = vmax.f32 %v381_v22, 0.0 }
 0x11c   : > { %v394_v27 = vmax.f32 %v376_v24, 0.0  ;;  %v642_v28 = vpop.f32.mrb[2].mxu0 }
 0x11d   : > { %v391_v29 = vadd.f32 %v642_v28, %v294_v26  ;;  %v385_v30 = vpop.f32.mrb[3].mxu0 }
 0x11e   : > { %v386_v31 = vadd.f32 %v385_v30, %v289_v19  ;;  %v662_v32 = vpack.c.bf16 %v395_v25, %v394_v27 }
 0x11f   : > { %v397_v33 = vmax.f32 %v391_v29, 0.0 }
 0x120   : > { %v396_v34 = vmax.f32 %v386_v31, 0.0  ;;  %663 = vmatprep.subr.bf16.mxu1 %v662_v32 }
 0x121   : > { %665 = vmatpush3.bf16.msra.mxu1 %v662_v32 }
 0x122   : > { %v666_v35 = vpack.c.bf16 %v397_v33, %v396_v34 }
 0x124   : > { %667 = vmatprep.subr.bf16.mxu1 %v666_v35 }
 0x125   : > { %669 = vmatpush3.bf16.msra.mxu1 %v666_v35 }
 0x128   : > { %652 = vmatmul.mubr.msk.f32.vlgmr.msra.gmra.mrb[0].mxu1 %vm296_vm0, %v265_v36 }
 0x1fb   : > { %v653_v38 = vpop.f32.mrb[0].mxu1 }
 0x1fc   : > { %v486_v40 = vadd.f32 %v653_v38, %v406_v37  ;;  %v480_v41 = vpop.f32.mrb[1].mxu1 }
 0x1fd   : > { %v481_v42 = vadd.f32 %v480_v41, %v401_v39 }
 0x1fe   : > { %491 = vst.msk [vmem:[%s259_s28 + $0x8] sm:$0xff] %vm489_vm1, %v486_v40 }
 0x1ff   : > { %490 = vst.msk [vmem:[%s259_s28] sm:$0xff] %vm489_vm1, %v481_v42 }
 0x200   : > { %782 = shalt.err (!%p779_p5)
}
 0x201   : > { %s783_s13 = scalar_lea.hbm %s1059_s17, 256  ;;  %s787_s27 = scalar_lea.hbm %s1113_s5, 512 }
 0x202   : > { %p784_p4 = scmp.ne.s32.totalorder %s1059_s17, %s783_s13  ;;  %p788_p12 = scmp.lt.u32.totalorder %s1059_s17, %s1113_s5 }
 0x203   : > { %p789_p1 = scmp.lt.u32.totalorder %s787_s27, %s783_s13  ;;  %p791_p8 = scmp.lt.u32.totalorder %s783_s13, %s1059_s17 }
 0x204   : > { %p785_p7 = pnand %p784_p4, %p1121_p9 }
 0x205   : > { %p790_p3 = por %p789_p1, %p788_p12 }
 0x206   : > { %p786_p10 = pneg %p785_p7 }
 0x207   : > { %p792_p11 = por %p791_p8, %p790_p3 }
 0x209   : > { %p793_p0 = pnand %p792_p11, %p786_p10 }
 0x20b   : > { %796 = shalt.err (!%p793_p0)
}
 0x20c   : > { %s858_s14 = smov 128   ;;  %s859_s16 = smov 8  }
 0x20d   : > { %672 = dma.vmem_to_hbm [thread:$0]  (%p1121_p9), %s1054_s10, 256, %s1059_s17, %s493_s21, %s858_s14, %s858_s14, %s859_s16  }
 0x20e PF: > { %s522_s24 = sand.u32 1, %s831_s18   ;;  %p1122_p6 = scmp.ne.s32.totalorder %s1118_s8, 0 }
 0x20f   : > { %p1123_p13 = scmp.ge.s32.totalorder %s851_s23, 2  ;;  %s523_s30 = scalar_lea.sflag [#allocation4], %s522_s24 }
 0x211   : > { %p679_p2 = pnand %p1123_p13, %p1122_p6 }
 0x213   : > { %826 = dma.done.wait (!%p679_p2), %s523_s30, 256  }
 0x214   : > { %828 = vsyncadd (!%p679_p2), %s523_s30, 4294967040  ;;  %s21_s23 = sadd.s32 1, %s851_s23   ;;  %s1124_s18 = smov %s835_s19 }
 0x215   : > { %p18_p5 = scmp.ge.s32.totalorder %s21_s23, 4   ;;  %s1125_s19 = smov %s839_s20 }
 0x216   : > { %s1126_s20 = smov %s946_s7  ;;  %s1127_s21 = smov %s847_s22 }
 0x217   : > { %s1128_s22 = smov %s1130_s26  ;;  %20 = sbr.rel (!%p18_p5) target bundleno = 6 (0x6), region = 85 }
 0x21e   :  { %528 = vsyncpa [#allocation3], 1 }
 0x21f   :  { %530 = vsyncpa [#allocation3 + $0x1], 1 }
 0x220   :  { %531 = vsyncpa [#allocation4], 1 }
 0x221   :  { %533 = vsyncpa [#allocation4 + $0x1], 1 }

</bundles_post_ra>
